<compile_context>
chip_gen: v5e
topology: v5e:2x2
jax: 0.10.0
libtpu: 0.0.40
codegen_flags: <defaults>
</compile_context>

<pallas_src>
import functools
import math
from typing import NamedTuple

import jax
import jax.numpy as jnp
import numpy as np
from jax import lax
from jax.experimental import pallas as pl
from jax.experimental.pallas import tpu as pltpu


# ------------------------------------------------------------------ helpers --

def _round_up(x, m):
    return (x + m - 1) // m * m


def _tpu_kind():
    try:
        dev = jax.devices()[0]
        return dev.device_kind.lower() if dev.platform == "tpu" else ""
    except Exception:
        return ""


_KIND = _tpu_kind()
# v6e / v7x have a bf16 VPU/EUP (fast bf16 tanh); v5e and older do not.
_BF16_EUP = not any(v in _KIND for v in ("v2", "v3", "v4", "v5"))
# v7x has 2 TensorCores per chip: keep the "parallel" batch grid >= 2 steps.
_TWO_CORES = "v7" in _KIND


def _default_tanh_dtype(tanh_dtype):
    if tanh_dtype is not None:
        return tanh_dtype
    return jnp.bfloat16 if _BF16_EUP else jnp.float32


def _nbytes(x):
    return x.size * x.dtype.itemsize


# -------------------------------------------------------- parameter packing --

class PackedParams(NamedTuple):
    """ODEFunc params packed/padded once (hoisted out of the per-eval path)."""
    w0: jax.Array       # (h_dims, DP)   layer-0 weight, output-dim zero-padded
    w_rest: jax.Array   # (L-1, DP, DP)  remaining weights, zero-padded
    b: jax.Array        # (L, 1, DP)     all biases, zero-padded, float32


def pack_params(weights, biases, compute_dtype=jnp.bfloat16):
    """Pad every hidden/output dim to a multiple of 128 and stack the layers.

    weights[i] has shape (in_i, out_i) (already (in, out), i.e. torch weight.T).
    Padding is exact zeros: zero weight rows/cols + zero bias keep padded lanes
    at exactly 0 through every tanh. Call ONCE and reuse the result.
    """
    n_layers = len(weights)
    assert n_layers >= 2 and len(biases) == n_layers
    dims = [w.shape[0] for w in weights] + [weights[-1].shape[1]]
    dp = _round_up(max(dims[1:]), 128)   # layer-0 input dim stays unpadded

    w0 = jnp.zeros((dims[0], dp), compute_dtype)
    w0 = w0.at[:, : dims[1]].set(weights[0].astype(compute_dtype))

    w_rest = jnp.zeros((n_layers - 1, dp, dp), compute_dtype)
    b = jnp.zeros((n_layers, 1, dp), jnp.float32)
    b = b.at[0, 0, : dims[1]].set(biases[0].astype(jnp.float32))
    for i in range(1, n_layers):
        w_rest = w_rest.at[i - 1, : weights[i].shape[0], : weights[i].shape[1]].set(
            weights[i].astype(compute_dtype))
        b = b.at[i, 0, : biases[i].shape[0]].set(biases[i].astype(jnp.float32))
    return PackedParams(w0, w_rest, b)


# ------------------------------------------------------------------ kernels --

def _row_splits(rows, n_sub):
    """Static contiguous row ranges; interior split points are 8-aligned."""
    if n_sub <= 1 or rows < 16:
        return ((0, rows),)
    chunk = _round_up(pl.cdiv(rows, n_sub), 8)
    splits, r = [], 0
    while r < rows:
        nxt = min(r + chunk, rows)
        splits.append((r, nxt))
        r = nxt
    return tuple(splits)


def _mlp_interleaved(z_list, w0_ref, wr_ref, b_ref, compute_dtype, tanh_dtype):
    """tanh(Linear(.)) for every layer, over independent row sub-tiles.

    Sub-tile chains are data-independent, so the scheduler overlaps one
    sub-tile's matmul (MXU) with another's bias-add + tanh (VPU/EUP).
    Returns per-sub-tile (rows_i, DP) activations in tanh_dtype; padded lanes
    are exactly 0.
    """
    n_rest = wr_ref.shape[0]
    # Layer 0: true (unpadded) contraction dim.
    w = w0_ref[...]
    bias = b_ref[0]
    acc = [jnp.dot(z.astype(compute_dtype), w, preferred_element_type=jnp.float32)
           for z in z_list]
    z_list = [jnp.tanh((a + bias).astype(tanh_dtype)) for a in acc]
    # Layers 1 .. L-1 (static unroll over layers).
    for l in range(n_rest):
        w = wr_ref[l]
        bias = b_ref[l + 1]
        acc = [jnp.dot(z.astype(compute_dtype), w, preferred_element_type=jnp.float32)
               for z in z_list]
        z_list = [jnp.tanh((a + bias).astype(tanh_dtype)) for a in acc]
    return z_list


def _forward_kernel(splits, out_dims, compute_dtype, tanh_dtype,
                    h_ref, w0_ref, wr_ref, b_ref, out_ref):
    h = h_ref[...]
    zs = [h[r0:r1] for (r0, r1) in splits]
    zs = _mlp_interleaved(zs, w0_ref, wr_ref, b_ref, compute_dtype, tanh_dtype)
    for (r0, r1), z in zip(splits, zs):
        out_ref[r0:r1, :] = z[:, :out_dims].astype(out_ref.dtype)


def _euler_kernel(splits, out_dims, compute_dtype, tanh_dtype, n_steps, dt, unroll,
                  h_ref, w0_ref, wr_ref, b_ref, out_ref):
    h = h_ref[...].astype(jnp.float32)
    zs0 = tuple(h[r0:r1] for (r0, r1) in splits)

    def body(_, zs):
        fs = _mlp_interleaved(list(zs), w0_ref, wr_ref, b_ref,
                              compute_dtype, tanh_dtype)
        # State carry stays f32; dynamics output sliced back to the true width.
        return tuple(z + dt * f[:, :out_dims].astype(jnp.float32)
                     for z, f in zip(zs, fs))

    zs = lax.fori_loop(0, n_steps, body, zs0, unroll=unroll)
    for (r0, r1), z in zip(splits, zs):
        out_ref[r0:r1, :] = z.astype(out_ref.dtype)


# ----------------------------------------------------------------- wrappers --

def _choose_batch_tile(batch, batch_tile, two_cores):
    if two_cores and batch > 8:
        tb = _round_up(pl.cdiv(batch, 2), 8)   # >= 2 grid steps -> shard both TCs
    else:
        tb = _round_up(batch, 8)               # one large tile on 1-TC parts
    tb = min(tb, batch_tile)
    if tb >= batch:
        tb = batch                             # full-dim block is always layout-legal
    return tb


def _launch(make_kernel, h, params, *, n_sub, batch_tile, two_cores, flops_scale):
    batch, in_dims = h.shape
    w0, w_rest, b = params
    assert w0.shape[0] == in_dims, "h feature dim must match the packed params"
    n_layers, _, dp = b.shape

    tb = _choose_batch_tile(batch, batch_tile, two_cores)
    grid = (pl.cdiv(batch, tb),)
    splits = _row_splits(tb, n_sub)
    kernel = make_kernel(splits, in_dims)

    in_specs = [
        pl.BlockSpec((tb, in_dims), lambda i: (i, 0)),     # activations (unpadded)
        pl.BlockSpec(w0.shape, lambda i: (0, 0)),          # resident layer-0 weight
        pl.BlockSpec(w_rest.shape, lambda i: (0, 0, 0)),   # resident remaining weights
        pl.BlockSpec(b.shape, lambda i: (0, 0, 0)),        # resident biases
    ]
    out_specs = pl.BlockSpec((tb, in_dims), lambda i: (i, 0))

    cost = pl.CostEstimate(
        flops=int(flops_scale) * 2 * batch * n_layers * dp * dp,
        transcendentals=int(flops_scale) * batch * n_layers * dp,
        bytes_accessed=int(2 * _nbytes(h) + _nbytes(w0) + _nbytes(w_rest) + _nbytes(b)),
    )

    return pl.pallas_call(
        kernel,
        grid=grid,
        in_specs=in_specs,
        out_specs=out_specs,
        out_shape=jax.ShapeDtypeStruct((batch, in_dims), h.dtype),
        compiler_params=pltpu.CompilerParams(
            dimension_semantics=("parallel",),
            vmem_limit_bytes=32 * 1024 * 1024,
        ),
        cost_estimate=cost,
    )(h, w0, w_rest, b)


@functools.partial(jax.jit,
                   static_argnames=("tanh_dtype", "n_sub", "batch_tile", "two_cores"))
def odefunc_forward(h, params, *, tanh_dtype=None, n_sub=2, batch_tile=2048,
                    two_cores=None):
    """ODEFunc.forward(t, h) = Tanh(ode_func(h)) as one fused Pallas kernel (t unused)."""
    compute_dtype = params.w0.dtype
    tanh_dtype = _default_tanh_dtype(tanh_dtype)
    two_cores = _TWO_CORES if two_cores is None else two_cores
    mk = lambda splits, out_dims: functools.partial(
        _forward_kernel, splits, out_dims, compute_dtype, tanh_dtype)
    return _launch(mk, h, params, n_sub=n_sub, batch_tile=batch_tile,
                   two_cores=two_cores, flops_scale=1)


@functools.partial(jax.jit,
                   static_argnames=("n_steps", "dt", "unroll", "tanh_dtype", "n_sub",
                                    "batch_tile", "two_cores"))
def odefunc_euler_solve(h0, params, *, n_steps, dt, unroll=True, tanh_dtype=None,
                        n_sub=2, batch_tile=2048, two_cores=None):
    """Fused fixed-step Euler: h_{k+1} = h_k + dt * ODEFunc(t, h_k), all in one kernel.

    Weights are DMA'd into VMEM once and the f32 state stays on-chip across all
    n_steps, amortizing launch + weight DMA over many RHS evaluations.
    """
    compute_dtype = params.w0.dtype
    tanh_dtype = _default_tanh_dtype(tanh_dtype)
    two_cores = _TWO_CORES if two_cores is None else two_cores
    mk = lambda splits, out_dims: functools.partial(
        _euler_kernel, splits, out_dims, compute_dtype, tanh_dtype,
        int(n_steps), float(dt), unroll)
    return _launch(mk, h0, params, n_sub=n_sub, batch_tile=batch_tile,
                   two_cores=two_cores, flops_scale=int(n_steps))


# --------------------------------------------------------------- init / ref --

def init_odefunc_params(key, h_dims, h_trans_dims, h_trans_layers):
    """torch.nn.Linear-style init (U(-k, k), k = 1/sqrt(fan_in)); W stored as (in, out)."""
    dims = [h_dims] + [h_trans_dims] * (h_trans_layers + 1) + [h_dims]
    weights, biases = [], []
    for i in range(len(dims) - 1):
        fan_in, fan_out = dims[i], dims[i + 1]
        k = 1.0 / math.sqrt(fan_in)
        key, kw, kb = jax.random.split(key, 3)
        weights.append(jax.random.uniform(kw, (fan_in, fan_out), jnp.float32, -k, k))
        biases.append(jax.random.uniform(kb, (fan_out,), jnp.float32, -k, k))
    return weights, biases


# -------------------------------------------------------------------- main --

if __name__ == "__main__":
    # Module config: h_dims must be set manually (= 2 * x_dims); pick x_dims = 16.
    h_dims = 32
    h_trans_dims = 100      # ODEFuncParams defaults
    h_trans_layers = 2
    batch = 2

    key = jax.random.PRNGKey(0)
    key, kh, kp = jax.random.split(key, 3)
    h = jax.random.normal(kh, (batch, h_dims), jnp.float32)
    t = jnp.float32(0.0)    # unused by ODEFunc.forward (signature parity only)

    weights, biases = init_odefunc_params(kp, h_dims, h_trans_dims, h_trans_layers)

    # Exact float64 host reference (independent of TPU matmul precision defaults).
    np_w = [np.asarray(w, np.float64) for w in weights]
    np_b = [np.asarray(b, np.float64) for b in biases]

    def ref_forward(x):
        z = np.asarray(x, np.float64)
        for w, b in zip(np_w, np_b):
            z = np.tanh(z @ w + b)
        return z

    def ref_euler(x, n_steps, dt):
        z = np.asarray(x, np.float64)
        for _ in range(n_steps):
            z = z + dt * ref_forward(z)
        return z

    # Pack once and reuse (hoisted out of the per-call path).
    params_bf16 = pack_params(weights, biases, jnp.bfloat16)   # default fast path
    params_f32 = pack_params(weights, biases, jnp.float32)     # exactness check

    # 1) forward, default bf16 matmuls (+ bf16 tanh on bf16-EUP parts).
    out = jax.block_until_ready(odefunc_forward(h, params_bf16))
    assert out.shape == (batch, h_dims)
    assert np.allclose(np.asarray(out), ref_forward(h), atol=5e-2, rtol=5e-2), \
        "bf16 forward mismatch"

    # 2) forward, all-f32 path: tight check of the exact layer semantics.
    out32 = jax.block_until_ready(
        odefunc_forward(h, params_f32, tanh_dtype=jnp.float32))
    assert np.allclose(np.asarray(out32), ref_forward(h), atol=1e-4, rtol=1e-4), \
        "f32 forward mismatch"

    # 3) larger batch: multi-tile "parallel" grid on 2-TC parts, one big tile on 1-TC.
    key, kb = jax.random.split(key)
    h_big = jax.random.normal(kb, (512, h_dims), jnp.float32)
    out_big = jax.block_until_ready(odefunc_forward(h_big, params_bf16))
    assert np.allclose(np.asarray(out_big), ref_forward(h_big), atol=5e-2, rtol=5e-2), \
        "batched forward mismatch"

    # 4) fused fixed-step Euler solver (unrolled in-kernel step loop).
    n_steps, dt = 16, 0.05
    eu32 = jax.block_until_ready(
        odefunc_euler_solve(h, params_f32, n_steps=n_steps, dt=dt,
                            tanh_dtype=jnp.float32))
    assert np.allclose(np.asarray(eu32), ref_euler(h, n_steps, dt),
                       atol=1e-3, rtol=1e-3), "f32 euler mismatch"

    # bf16 Euler accumulates per-layer cast error over n_steps -> loose tolerance.
    eu_bf16 = jax.block_until_ready(
        odefunc_euler_solve(h, params_bf16, n_steps=n_steps, dt=dt))
    assert np.allclose(np.asarray(eu_bf16), ref_euler(h, n_steps, dt),
                       atol=1e-1, rtol=1e-1), "bf16 euler mismatch"

    print("KERNEL_OK")
</pallas_src>

<mosaic_0001>
module attributes {stable_mosaic.version = 11 : i64} {
  func.func @_forward_kernel(%arg0: i32, %arg1: memref<2x32xf32, #tpu.memory_space<vmem>>, %arg2: memref<32x128xbf16, #tpu.memory_space<vmem>>, %arg3: memref<3x128x128xbf16, #tpu.memory_space<vmem>>, %arg4: memref<4x1x128xf32, #tpu.memory_space<vmem>>, %arg5: memref<2x32xf32, #tpu.memory_space<vmem>>) attributes {dimension_semantics = [#tpu.dimension_semantics<parallel>], iteration_bounds = array<i64: 1>, scalar_prefetch = 0 : i64, scratch_operands = 0 : i64, tpu.core_type = #tpu.core_type<tc>, window_params = [{transform_indices = @transform_0, window_bounds = array<i64: 2, 32>}, {pipeline_mode = #tpu.pipeline_mode<synchronous>, transform_indices = @transform_1, window_bounds = array<i64: 32, 128>}, {pipeline_mode = #tpu.pipeline_mode<synchronous>, transform_indices = @transform_2, window_bounds = array<i64: 3, 128, 128>}, {pipeline_mode = #tpu.pipeline_mode<synchronous>, transform_indices = @transform_3, window_bounds = array<i64: 4, 1, 128>}, {transform_indices = @transform_4, window_bounds = array<i64: 2, 32>}]} {
    %c0 = arith.constant 0 : index
    %c0_0 = arith.constant 0 : index
    %0 = vector.load %arg1[%c0, %c0_0] : memref<2x32xf32, #tpu.memory_space<vmem>>, vector<2x32xf32>
    %c0_1 = arith.constant 0 : index
    %c0_2 = arith.constant 0 : index
    %1 = vector.load %arg2[%c0_1, %c0_2] : memref<32x128xbf16, #tpu.memory_space<vmem>>, vector<32x128xbf16>
    %c0_3 = arith.constant 0 : index
    %c0_4 = arith.constant 0 : index
    %c0_5 = arith.constant 0 : index
    %2 = vector.load %arg4[%c0_3, %c0_4, %c0_5] : memref<4x1x128xf32, #tpu.memory_space<vmem>>, vector<1x1x128xf32>
    %3 = vector.shape_cast %2 : vector<1x1x128xf32> to vector<1x128xf32>
    %4 = arith.truncf %0 : vector<2x32xf32> to vector<2x32xbf16>
    %cst = arith.constant dense<0.000000e+00> : vector<2x128xf32>
    %5 = tpu.matmul %4, %1, %cst {dimension_numbers = #tpu.dot_dimension_numbers<[1], [0], [0], [1], [0, 0, 1, 1], [], []>} : vector<2x32xbf16>, vector<32x128xbf16>, vector<2x128xf32> -> vector<2x128xf32>
    %6 = vector.broadcast %3 : vector<1x128xf32> to vector<2x128xf32>
    %7 = arith.addf %5, %6 : vector<2x128xf32>
    %8 = arith.truncf %7 : vector<2x128xf32> to vector<2x128xbf16>
    %9 = math.tanh %8 : vector<2x128xbf16>
    %c0_6 = arith.constant 0 : index
    %c0_7 = arith.constant 0 : index
    %c0_8 = arith.constant 0 : index
    %10 = vector.load %arg3[%c0_6, %c0_7, %c0_8] : memref<3x128x128xbf16, #tpu.memory_space<vmem>>, vector<1x128x128xbf16>
    %11 = vector.shape_cast %10 : vector<1x128x128xbf16> to vector<128x128xbf16>
    %c1 = arith.constant 1 : index
    %c0_9 = arith.constant 0 : index
    %c0_10 = arith.constant 0 : index
    %12 = vector.load %arg4[%c1, %c0_9, %c0_10] : memref<4x1x128xf32, #tpu.memory_space<vmem>>, vector<1x1x128xf32>
    %13 = vector.shape_cast %12 : vector<1x1x128xf32> to vector<1x128xf32>
    %cst_11 = arith.constant dense<0.000000e+00> : vector<2x128xf32>
    %14 = tpu.matmul %9, %11, %cst_11 {dimension_numbers = #tpu.dot_dimension_numbers<[1], [0], [0], [1], [0, 0, 1, 1], [], []>} : vector<2x128xbf16>, vector<128x128xbf16>, vector<2x128xf32> -> vector<2x128xf32>
    %15 = vector.broadcast %13 : vector<1x128xf32> to vector<2x128xf32>
    %16 = arith.addf %14, %15 : vector<2x128xf32>
    %17 = arith.truncf %16 : vector<2x128xf32> to vector<2x128xbf16>
    %18 = math.tanh %17 : vector<2x128xbf16>
    %c1_12 = arith.constant 1 : index
    %c0_13 = arith.constant 0 : index
    %c0_14 = arith.constant 0 : index
    %19 = vector.load %arg3[%c1_12, %c0_13, %c0_14] : memref<3x128x128xbf16, #tpu.memory_space<vmem>>, vector<1x128x128xbf16>
    %20 = vector.shape_cast %19 : vector<1x128x128xbf16> to vector<128x128xbf16>
    %c2 = arith.constant 2 : index
    %c0_15 = arith.constant 0 : index
    %c0_16 = arith.constant 0 : index
    %21 = vector.load %arg4[%c2, %c0_15, %c0_16] : memref<4x1x128xf32, #tpu.memory_space<vmem>>, vector<1x1x128xf32>
    %22 = vector.shape_cast %21 : vector<1x1x128xf32> to vector<1x128xf32>
    %cst_17 = arith.constant dense<0.000000e+00> : vector<2x128xf32>
    %23 = tpu.matmul %18, %20, %cst_17 {dimension_numbers = #tpu.dot_dimension_numbers<[1], [0], [0], [1], [0, 0, 1, 1], [], []>} : vector<2x128xbf16>, vector<128x128xbf16>, vector<2x128xf32> -> vector<2x128xf32>
    %24 = vector.broadcast %22 : vector<1x128xf32> to vector<2x128xf32>
    %25 = arith.addf %23, %24 : vector<2x128xf32>
    %26 = arith.truncf %25 : vector<2x128xf32> to vector<2x128xbf16>
    %27 = math.tanh %26 : vector<2x128xbf16>
    %c2_18 = arith.constant 2 : index
    %c0_19 = arith.constant 0 : index
    %c0_20 = arith.constant 0 : index
    %28 = vector.load %arg3[%c2_18, %c0_19, %c0_20] : memref<3x128x128xbf16, #tpu.memory_space<vmem>>, vector<1x128x128xbf16>
    %29 = vector.shape_cast %28 : vector<1x128x128xbf16> to vector<128x128xbf16>
    %c3 = arith.constant 3 : index
    %c0_21 = arith.constant 0 : index
    %c0_22 = arith.constant 0 : index
    %30 = vector.load %arg4[%c3, %c0_21, %c0_22] : memref<4x1x128xf32, #tpu.memory_space<vmem>>, vector<1x1x128xf32>
    %31 = vector.shape_cast %30 : vector<1x1x128xf32> to vector<1x128xf32>
    %cst_23 = arith.constant dense<0.000000e+00> : vector<2x128xf32>
    %32 = tpu.matmul %27, %29, %cst_23 {dimension_numbers = #tpu.dot_dimension_numbers<[1], [0], [0], [1], [0, 0, 1, 1], [], []>} : vector<2x128xbf16>, vector<128x128xbf16>, vector<2x128xf32> -> vector<2x128xf32>
    %33 = vector.broadcast %31 : vector<1x128xf32> to vector<2x128xf32>
    %34 = arith.addf %32, %33 : vector<2x128xf32>
    %35 = arith.truncf %34 : vector<2x128xf32> to vector<2x128xbf16>
    %36 = math.tanh %35 : vector<2x128xbf16>
    %37 = vector.extract_strided_slice %36 {offsets = [0, 0], sizes = [2, 32], strides = [1, 1]} : vector<2x128xbf16> to vector<2x32xbf16>
    %38 = arith.extf %37 : vector<2x32xbf16> to vector<2x32xf32>
    %c0_24 = arith.constant 0 : index
    %c0_25 = arith.constant 0 : index
    %39 = vector.load %arg5[%c0_24, %c0_25] : memref<2x32xf32, #tpu.memory_space<vmem>>, vector<2x32xf32>
    tpu.vector_store %arg5[%c0_24, %c0_25], %38 {strides = array<i32>} : memref<2x32xf32, #tpu.memory_space<vmem>>, vector<2x32xf32>,
    return
  }
  func.func @transform_0(%arg0: i32) -> (i32, i32) {
    %c0_i32 = arith.constant 0 : i32
    %c0_i32_0 = arith.constant 0 : i32
    return %arg0, %c0_i32 : i32, i32
  }
  func.func @transform_1(%arg0: i32) -> (i32, i32) {
    %c0_i32 = arith.constant 0 : i32
    %c0_i32_0 = arith.constant 0 : i32
    %c0_i32_1 = arith.constant 0 : i32
    return %c0_i32, %c0_i32_0 : i32, i32
  }
  func.func @transform_2(%arg0: i32) -> (i32, i32, i32) {
    %c0_i32 = arith.constant 0 : i32
    %c0_i32_0 = arith.constant 0 : i32
    %c0_i32_1 = arith.constant 0 : i32
    %c0_i32_2 = arith.constant 0 : i32
    return %c0_i32, %c0_i32_0, %c0_i32_1 : i32, i32, i32
  }
  func.func @transform_3(%arg0: i32) -> (i32, i32, i32) {
    %c0_i32 = arith.constant 0 : i32
    %c0_i32_0 = arith.constant 0 : i32
    %c0_i32_1 = arith.constant 0 : i32
    %c0_i32_2 = arith.constant 0 : i32
    return %c0_i32, %c0_i32_0, %c0_i32_1 : i32, i32, i32
  }
  func.func @transform_4(%arg0: i32) -> (i32, i32) {
    %c0_i32 = arith.constant 0 : i32
    %c0_i32_0 = arith.constant 0 : i32
    return %arg0, %c0_i32 : i32, i32
  }
}

</mosaic_0001>

<bundles_post_ra>
// kernel: odefunc_forward.1
= control target key start
LH: loop header
LB: loop body
LE: loop exit
PB: predicated region body
PF: predicated region fallthrough
CT: control target
= control target key end

     0   :  { %9 = vsyncpa [#allocation3], 0  ;;  %s734_s0 = inlined_call_operand.hbm [shape: f32[2,32], index: 0, kind: input, shape index: {}]   ;;  %s735_s1 = inlined_call_operand.hbm [shape: bf16[32,128], index: 1, kind: input, shape index: {}]   ;;  %s736_s2 = inlined_call_operand.hbm [shape: bf16[3,128,128], index: 2, kind: input, shape index: {}]   ;;  %s737_s3 = inlined_call_operand.hbm [shape: f32[4,1,128], index: 3, kind: input, shape index: {}]   ;;  %s738_s4 = inlined_call_operand.hbm [shape: f32[2,32], index: 4, kind: output, shape index: {}]  }
   0x1   :  { %10 = vsyncpa [#allocation6], 0 }
   0x2   :  { %11 = vsyncpa [#allocation9], 0  ;;  %s28_s17 = sshll.u32 %s735_s1, 4  ;;  %s29_s17 = int_to_ptr.hbm [resolvable:$true] %s28_s17 }
   0x3   :  { %12 = vsyncpa [#allocation4], 0  ;;  %s685_s18 = smov [#allocation5]   ;;  %s18_s22 = sshll.u32 %s734_s0, 4  ;;  %s19_s22 = int_to_ptr.hbm [resolvable:$true] %s18_s22 }
   0x4   :  { %s30_s19 = sshll.u32 %s685_s18, 4  ;;  %s686_s23 = smov 64   ;;  %s31_s19 = int_to_ptr.vmem [resolvable:$true] %s30_s19 }
   0x5   :  { %s687_s24 = smov 4   ;;  %s688_s25 = smov [#allocation2]  }
   0x6   :  { %36 = dma.hbm_to_vmem [thread:$0]  %s29_s17, 256, %s31_s19, [#allocation6], %s686_s23, %s686_s23, %s687_s24  }
   0x7   :  { %s20_s26 = sshll.u32 %s688_s25, 4  ;;  %s41_s29 = sshll.u32 %s736_s2, 4  ;;  %s21_s26 = int_to_ptr.vmem [resolvable:$true] %s20_s26  ;;  %s42_s29 = int_to_ptr.hbm [resolvable:$true] %s41_s29 }
   0x8   :  { %23 = dma.hbm_to_vmem [thread:$0]  %s19_s22, 32, %s21_s26, [#allocation3]  }
   0x9   :  { %s54_s5 = sshll.u32 %s737_s3, 4  ;;  %s689_s6 = smov [#allocation7]   ;;  %s55_s5 = int_to_ptr.hbm [resolvable:$true] %s54_s5 }
   0xa   :  { %s43_s7 = sshll.u32 %s689_s6, 4  ;;  %s690_s0 = smov [#allocation8]   ;;  %s44_s7 = int_to_ptr.vmem [resolvable:$true] %s43_s7 }
   0xb   :  { %49 = dma.hbm_to_vmem [thread:$0]  %s42_s29, 3072, %s44_s7, [#allocation6], %s686_s23, %s686_s23, %s687_s24  }
   0xc   :  { %s56_s8 = sshll.u32 %s690_s0, 4  ;;  %s691_s9 = smov 16   ;;  %s57_s8 = int_to_ptr.vmem [resolvable:$true] %s56_s8 }
   0xd   :  { %s692_s10 = smov 1  }
   0xe   :  { %62 = dma.hbm_to_vmem [thread:$0]  %s55_s5, 64, %s57_s8, [#allocation9], %s691_s9, %s691_s9, %s692_s10  }
   0xf   :  { %677 = dma.done.wait [#allocation3], 32  }
  0x10   :  { %678 = vsyncadd [#allocation3], 4294967264 }
  0x11   :  { %679 = dma.done.wait [#allocation6], 3328  }
  0x12   :  { %680 = vsyncadd [#allocation6], 4294963968 }
  0x13   :  { %681 = dma.done.wait [#allocation9], 64  }
  0x14   :  { %682 = vsyncadd [#allocation9], 4294967232  ;;  %v511_v0 = vld [vmem:[#allocation5 + $0x8] sm:$0xff]  ;;  %v510_v1 = vld [vmem:[#allocation5] sm:$0xff]  ;;  %vm102_vm0 = vcmask 261120   ;;  %s693_s2 = smov [#allocation10]  }
  0x15   :  { %v519_v2 = vld [vmem:[#allocation7 + $0x38] sm:$0xff]  ;;  %112 = vmatpush.bf16.msra.mxu0 %v511_v0  ;;  %v80_v3 = vld [vmem:[#allocation2] sm:$0x3]  ;;  %v518_v4 = vld [vmem:[#allocation7 + $0x30] sm:$0xff]  ;;  %s391_s3 = sshll.u32 %s693_s2, 4  ;;  %s393_s13 = sshll.u32 %s738_s4, 4  ;;  %s392_s3 = int_to_ptr.vmem [resolvable:$true] %s391_s3  ;;  %s394_s13 = int_to_ptr.hbm [resolvable:$true] %s393_s13 }
  0x16   :  { %192 = vmatpush.bf16.msra.mxu1 %v519_v2  ;;  %v86_v5 = vpack.c.bf16 %v80_v3, %v80_v3  ;;  %v517_v6 = vld [vmem:[#allocation7 + $0x28] sm:$0xff]  ;;  %v516_v7 = vld [vmem:[#allocation7 + $0x20] sm:$0xff]  ;;  %v515_v8 = vld [vmem:[#allocation7 + $0x18] sm:$0xff]  ;;  %vm384_vm1 = vcmask 254976  }
  0x17   :  { %v514_v9 = vld [vmem:[#allocation7 + $0x10] sm:$0xff]  ;;  %v513_v10 = vld [vmem:[#allocation7 + $0x8] sm:$0xff]  ;;  %v512_v11 = vld [vmem:[#allocation7] sm:$0xff] }
  0x18   :  { %v527_v12 = vld [vmem:[#allocation7 + $0x78] sm:$0xff]  ;;  %v526_v13 = vld [vmem:[#allocation7 + $0x70] sm:$0xff]  ;;  %v525_v14 = vld [vmem:[#allocation7 + $0x68] sm:$0xff] }
  0x19   :  { %113 = vmatpush.bf16.msra.mxu0 %v510_v1  ;;  %279 = vmatpush.bf16.msra.mxu2 %v527_v12  ;;  %v524_v15 = vld [vmem:[#allocation7 + $0x60] sm:$0xff]  ;;  %v523_v24 = vld [vmem:[#allocation7 + $0x58] sm:$0xff]  ;;  %v522_v25 = vld [vmem:[#allocation7 + $0x50] sm:$0xff] }
  0x1a   :  { %193 = vmatpush.bf16.msra.mxu1 %v518_v4  ;;  %v545_v16 = vld [vmem:[#allocation8] ss:$0 sm:$0xff]  ;;  %v521_v26 = vld [vmem:[#allocation7 + $0x48] sm:$0xff]  ;;  %v535_v28 = vld [vmem:[#allocation7 + $0xb8] sm:$0xff] }
  0x1b   :  { %v520_v27 = vld [vmem:[#allocation7 + $0x40] sm:$0xff]  ;;  %366 = vmatpush.bf16.msra.mxu3 %v535_v28  ;;  %v534_v29 = vld [vmem:[#allocation7 + $0xb0] sm:$0xff]  ;;  %v533_v30 = vld [vmem:[#allocation7 + $0xa8] sm:$0xff] }
  0x1c   :  { %413 = vmatmul.msk.bf16.vlgmr.msra.gmra.mxu0 %vm102_vm0, %v86_v5  ;;  %v532_v31 = vld [vmem:[#allocation7 + $0xa0] sm:$0xff]  ;;  %v531_v40 = vld [vmem:[#allocation7 + $0x98] sm:$0xff]  ;;  %v530_v41 = vld [vmem:[#allocation7 + $0x90] sm:$0xff] }
  0x1d   :  { %280 = vmatpush.bf16.msra.mxu2 %v526_v13  ;;  %v546_v32 = vld [vmem:[#allocation8 + $0x1] ss:$0 sm:$0xff]  ;;  %v529_v42 = vld [vmem:[#allocation7 + $0x88] sm:$0xff]  ;;  %v547_v44 = vld [vmem:[#allocation8 + $0x2] ss:$0 sm:$0xff] }
  0x1e   :  { %194 = vmatpush.bf16.msra.mxu1 %v517_v6  ;;  %v528_v43 = vld [vmem:[#allocation7 + $0x80] sm:$0xff] }
  0x1f   :  { %367 = vmatpush.bf16.msra.mxu3 %v534_v29  ;;  %v548_v52 = vld [vmem:[#allocation8 + $0x3] ss:$0 sm:$0xff] }
  0x21   :  { %281 = vmatpush.bf16.msra.mxu2 %v525_v14 }
  0x22   :  { %195 = vmatpush.bf16.msra.mxu1 %v516_v7 }
  0x23   :  { %368 = vmatpush.bf16.msra.mxu3 %v533_v30 }
  0x25   :  { %282 = vmatpush.bf16.msra.mxu2 %v524_v15 }
  0x26   :  { %196 = vmatpush.bf16.msra.mxu1 %v515_v8 }
  0x27   :  { %369 = vmatpush.bf16.msra.mxu3 %v532_v31 }
  0x29   :  { %283 = vmatpush.bf16.msra.mxu2 %v523_v24 }
  0x2a   :  { %197 = vmatpush.bf16.msra.mxu1 %v514_v9 }
  0x2b   :  { %370 = vmatpush.bf16.msra.mxu3 %v531_v40 }
  0x2d   :  { %284 = vmatpush.bf16.msra.mxu2 %v522_v25 }
  0x2e   :  { %198 = vmatpush.bf16.msra.mxu1 %v513_v10 }
  0x2f   :  { %371 = vmatpush.bf16.msra.mxu3 %v530_v41 }
  0x31   :  { %285 = vmatpush.bf16.msra.mxu2 %v521_v26 }
  0x32   :  { %199 = vmatpush.bf16.msra.mxu1 %v512_v11 }
  0x33   :  { %372 = vmatpush.bf16.msra.mxu3 %v529_v42 }
  0x35   :  { %286 = vmatpush.bf16.msra.mxu2 %v520_v27 }
  0x37   :  { %373 = vmatpush.bf16.msra.mxu3 %v528_v43 }
  0x99   :  { %v115_v17 = vpop.f32.mrf.mxu0 }
  0x9a   :  { %v116_v18 = vadd.f32 %v545_v16, %v115_v17 }
  0x9c   :  { %v119_v19 = vpack.c.bf16 %v116_v18, %v116_v18 }
  0x9e   :  { %v120_v20 = vunpack.c.l.bf16 %v119_v19 }
  0xa0   :  { %549 = vtanh.f32 %v120_v20 }
  0xa1   :  { %v117_v21 = vpop.f32.mrf.mxu0 }
  0xa6   :  { %v550_v22 = vpop.eup %549 }
  0xa7   :  { %v122_v23 = vpack.c.bf16 %v550_v22, %v550_v22 }
  0xa9   :  { %200 = vmatmul.bf16.vlgmr.msra.gmra.mxu1 %v122_v23 }
 0x126   :  { %v201_v33 = vpop.f32.mrf.mxu1 }
 0x127   :  { %v202_v34 = vadd.f32 %v546_v32, %v201_v33 }
 0x129   :  { %v205_v35 = vpack.c.bf16 %v202_v34, %v202_v34 }
 0x12b   :  { %v206_v36 = vunpack.c.l.bf16 %v205_v35 }
 0x12d   :  { %551 = vtanh.f32 %v206_v36 }
 0x12e   :  { %v203_v37 = vpop.f32.mrf.mxu1 }
 0x133   :  { %v552_v38 = vpop.eup %551 }
 0x134   :  { %v208_v39 = vpack.c.bf16 %v552_v38, %v552_v38 }
 0x136   :  { %287 = vmatmul.bf16.vlgmr.msra.gmra.mxu2 %v208_v39 }
 0x1b9   :  { %v288_v45 = vpop.f32.mrf.mxu2 }
 0x1ba   :  { %v289_v46 = vadd.f32 %v547_v44, %v288_v45 }
 0x1bc   :  { %v292_v47 = vpack.c.bf16 %v289_v46, %v289_v46 }
 0x1be   :  { %v293_v48 = vunpack.c.l.bf16 %v292_v47 }
 0x1c0   :  { %553 = vtanh.f32 %v293_v48 }
 0x1c1   :  { %v290_v49 = vpop.f32.mrf.mxu2 }
 0x1c6   :  { %v554_v50 = vpop.eup %553 }
 0x1c7   :  { %v295_v51 = vpack.c.bf16 %v554_v50, %v554_v50 }
 0x1c9   :  { %374 = vmatmul.bf16.vlgmr.msra.gmra.mxu3 %v295_v51 }
 0x24c   :  { %v375_v53 = vpop.f32.mrf.mxu3 }
 0x24d   :  { %v376_v54 = vadd.f32 %v548_v52, %v375_v53 }
 0x24f   :  { %v379_v55 = vpack.c.bf16 %v376_v54, %v376_v54 }
 0x251   :  { %v380_v56 = vunpack.c.l.bf16 %v379_v55 }
 0x253   :  { %555 = vtanh.f32 %v380_v56 }
 0x254   :  { %v377_v57 = vpop.f32.mrf.mxu3 }
 0x259   :  { %v556_v58 = vpop.eup %555 }
 0x25a   :  { %v382_v59 = vpack.c.bf16 %v556_v58, %v556_v58 }
 0x25c   :  { %v383_v60 = vunpack.c.l.bf16 %v382_v59 }
 0x25e   :  { %385 = vst.msk [vmem:[#allocation10] sm:$0x3] %vm384_vm1, %v383_v60 }
 0x25f   :  { %396 = dma.vmem_to_hbm [thread:$0]  %s392_s3, 32, %s394_s13, [#allocation4]  }
 0x260   :  { %683 = dma.done.wait [#allocation4], 32  }
 0x261   :  { %684 = vsyncadd [#allocation4], 4294967264 }
 0x262   :  { %401 = vsyncpa [#allocation3], 1 }
 0x263   :  { %402 = vsyncpa [#allocation6], 1 }
 0x264   :  { %403 = vsyncpa [#allocation9], 1 }
 0x265   :  { %404 = vsyncpa [#allocation4], 1 }

</bundles_post_ra>
